<compile_context>
chip_gen: v6e
topology: v6e:2x2x1
jax: 0.10.0
libtpu: 0.0.40
codegen_flags: <defaults>
</compile_context>

<pallas_src>
import math
from functools import partial

import jax
import jax.numpy as jnp
from jax.experimental import pallas as pl
from jax.experimental.pallas import tpu as pltpu


def _noisy_linear_kernel(x_ref, wmu_ref, wsig_ref, ein_ref, eout_ref,
                         bmu_ref, bsig_ref, o_ref, acc_ref, *, mxu_dtype):
    """One (n, k) grid step of y = x @ (Wmu + Wsig * eps_out⊗eps_in).T + b."""
    k = pl.program_id(1)

    @pl.when(k == 0)
    def _():
        acc_ref[...] = jnp.zeros_like(acc_ref)

    # Rank-1 noise for this weight tile: (tk, 1) * (1, tn) -> (tk, tn).
    # Noisy weight tile already in (K, N) layout -> plain MXU contraction.
    w = wmu_ref[...] + wsig_ref[...] * (ein_ref[...] * eout_ref[...])
    acc_ref[...] += jnp.dot(
        x_ref[...].astype(mxu_dtype), w.astype(mxu_dtype),
        preferred_element_type=jnp.float32)

    @pl.when(k == pl.num_programs(1) - 1)
    def _():
        bias = bmu_ref[...] + bsig_ref[...] * eout_ref[...]          # (1, tn)
        o_ref[...] = (acc_ref[...] + bias).astype(o_ref.dtype)


def noisy_linear(x, weight_mu, weight_sigma, eps_in, eps_out,
                 bias_mu, bias_sigma, *, tile_n=256, tile_k=512,
                 mxu_dtype=None):
    """Training-mode NoisyLinear forward.

    x            : (B, In)
    weight_mu    : (Out, In)   (PyTorch nn.Linear convention)
    weight_sigma : (Out, In)
    eps_in       : (In,)   factored noise (weight_epsilon == outer(eps_out, eps_in))
    eps_out      : (Out,)  factored noise (bias_epsilon == eps_out)
    bias_mu      : (Out,)
    bias_sigma   : (Out,)
    mxu_dtype    : dtype fed to the MXU (e.g. jnp.bfloat16 on v6e/v7x);
                   defaults to x.dtype. Accumulation is always f32.
    """
    B, In = x.shape
    Out = weight_mu.shape[0]
    if mxu_dtype is None:
        mxu_dtype = x.dtype

    tn = min(tile_n, Out)
    tk = min(tile_k, In)
    assert Out % tn == 0 and In % tk == 0, "Out/In must divide the tile sizes"

    # Pre-transpose once so the kernel RHS tiles are (K, N). In a real training
    # setup the parameters would simply be stored in this layout.
    wmu_t = weight_mu.T                      # (In, Out)
    wsig_t = weight_sigma.T                  # (In, Out)
    ein = eps_in.reshape(In, 1)
    eout = eps_out.reshape(1, Out)
    bmu = bias_mu.reshape(1, Out)
    bsig = bias_sigma.reshape(1, Out)

    grid = (Out // tn, In // tk)             # reduction (K) axis last

    itemsize = jnp.dtype(x.dtype).itemsize
    cost = pl.CostEstimate(
        flops=2 * B * In * Out + 2 * In * Out,
        transcendentals=0,
        bytes_accessed=itemsize * (2 * In * Out + B * In + B * Out + In + 3 * Out),
    )

    return pl.pallas_call(
        partial(_noisy_linear_kernel, mxu_dtype=mxu_dtype),
        out_shape=jax.ShapeDtypeStruct((B, Out), x.dtype),
        grid_spec=pltpu.PrefetchScalarGridSpec(
            num_scalar_prefetch=0,
            grid=grid,
            in_specs=[
                pl.BlockSpec((B, tk), lambda n, k: (0, k)),    # x
                pl.BlockSpec((tk, tn), lambda n, k: (k, n)),   # weight_mu.T
                pl.BlockSpec((tk, tn), lambda n, k: (k, n)),   # weight_sigma.T
                pl.BlockSpec((tk, 1), lambda n, k: (k, 0)),    # eps_in (K,1)
                pl.BlockSpec((1, tn), lambda n, k: (0, n)),    # eps_out (1,N)
                pl.BlockSpec((1, tn), lambda n, k: (0, n)),    # bias_mu
                pl.BlockSpec((1, tn), lambda n, k: (0, n)),    # bias_sigma
            ],
            out_specs=pl.BlockSpec((B, tn), lambda n, k: (0, n)),
            scratch_shapes=[pltpu.VMEM((B, tn), jnp.float32)],
        ),
        compiler_params=pltpu.CompilerParams(
            dimension_semantics=("parallel", "arbitrary")),
        cost_estimate=cost,
    )(x, wmu_t, wsig_t, ein, eout, bmu, bsig)


def init_noisy_linear_params(key, in_features, out_features, std_init=0.5):
    """Deterministic re-implementation of reset_parameters() + reset_noise().

    Returns the factored noise vectors (eps_in, eps_out) instead of the
    materialized weight_epsilon = outer(eps_out, eps_in).
    """
    k_wmu, k_bmu, k_ein, k_eout = jax.random.split(key, 4)
    mu_range = 1.0 / math.sqrt(in_features)

    weight_mu = jax.random.uniform(
        k_wmu, (out_features, in_features), jnp.float32, -mu_range, mu_range)
    weight_sigma = jnp.full((out_features, in_features),
                            std_init / math.sqrt(in_features), jnp.float32)
    bias_mu = jax.random.uniform(
        k_bmu, (out_features,), jnp.float32, -mu_range, mu_range)
    bias_sigma = jnp.full((out_features,),
                          std_init / math.sqrt(out_features), jnp.float32)

    def scale_noise(k, size):
        v = jax.random.normal(k, (size,), jnp.float32)
        return jnp.sign(v) * jnp.sqrt(jnp.abs(v))

    eps_in = scale_noise(k_ein, in_features)
    eps_out = scale_noise(k_eout, out_features)

    return weight_mu, weight_sigma, bias_mu, bias_sigma, eps_in, eps_out


def _reference(x, weight_mu, weight_sigma, bias_mu, bias_sigma, eps_in, eps_out):
    w = weight_mu + weight_sigma * jnp.outer(eps_out, eps_in)
    b = bias_mu + bias_sigma * eps_out
    return x @ w.T + b


if __name__ == "__main__":
    key = jax.random.PRNGKey(0)
    k_x, k_p, k_x2, k_p2 = jax.random.split(key, 4)

    # --- Case 1: single-tile path (grid = (1, 1)) -----------------------------
    batch, in_features, out_features = 8, 128, 128
    x = jax.random.normal(k_x, (batch, in_features), jnp.float32)
    wmu, wsig, bmu, bsig, ein, eout = init_noisy_linear_params(
        k_p, in_features, out_features, std_init=0.5)

    y = jax.block_until_ready(noisy_linear(x, wmu, wsig, ein, eout, bmu, bsig))
    y_ref = _reference(x, wmu, wsig, bmu, bsig, ein, eout)
    assert jnp.allclose(y, y_ref, atol=1e-4, rtol=1e-4), "case 1 mismatch"

    # --- Case 2: multi-tile grid exercising the K-reduction accumulator -------
    batch2, in2, out2 = 8, 256, 256
    x2 = jax.random.normal(k_x2, (batch2, in2), jnp.float32)
    wmu2, wsig2, bmu2, bsig2, ein2, eout2 = init_noisy_linear_params(
        k_p2, in2, out2, std_init=0.5)

    y2 = jax.block_until_ready(
        noisy_linear(x2, wmu2, wsig2, ein2, eout2, bmu2, bsig2,
                     tile_n=128, tile_k=128))            # grid = (2, 2)
    y2_ref = _reference(x2, wmu2, wsig2, bmu2, bsig2, ein2, eout2)
    assert jnp.allclose(y2, y2_ref, atol=1e-4, rtol=1e-4), "case 2 mismatch"

    print("KERNEL_OK")
</pallas_src>

<mosaic_0001>
module attributes {stable_mosaic.version = 11 : i64} {
  func.func @_noisy_linear_kernel(%arg0: i32, %arg1: i32, %arg2: memref<8x128xf32, #tpu.memory_space<vmem>>, %arg3: memref<128x128xf32, #tpu.memory_space<vmem>>, %arg4: memref<128x128xf32, #tpu.memory_space<vmem>>, %arg5: memref<128x1xf32, #tpu.memory_space<vmem>>, %arg6: memref<1x128xf32, #tpu.memory_space<vmem>>, %arg7: memref<1x128xf32, #tpu.memory_space<vmem>>, %arg8: memref<1x128xf32, #tpu.memory_space<vmem>>, %arg9: memref<8x128xf32, #tpu.memory_space<vmem>>, %arg10: memref<8x128xf32, #tpu.memory_space<vmem>>) attributes {dimension_semantics = [#tpu.dimension_semantics<parallel>, #tpu.dimension_semantics<arbitrary>], iteration_bounds = array<i64: 1, 1>, scalar_prefetch = 0 : i64, scratch_operands = 1 : i64, tpu.core_type = #tpu.core_type<tc>, window_params = [{transform_indices = @transform_0, window_bounds = array<i64: 8, 128>}, {transform_indices = @transform_1, window_bounds = array<i64: 128, 128>}, {transform_indices = @transform_2, window_bounds = array<i64: 128, 128>}, {transform_indices = @transform_3, window_bounds = array<i64: 128, 1>}, {transform_indices = @transform_4, window_bounds = array<i64: 1, 128>}, {transform_indices = @transform_5, window_bounds = array<i64: 1, 128>}, {transform_indices = @transform_6, window_bounds = array<i64: 1, 128>}, {transform_indices = @transform_7, window_bounds = array<i64: 8, 128>}]} {
    %c0_i32 = arith.constant 0 : i32
    %0 = arith.cmpi eq, %arg1, %c0_i32 : i32
    %1 = arith.extui %0 : i1 to i32
    %c0_i32_0 = arith.constant 0 : i32
    %2 = arith.cmpi ne, %1, %c0_i32_0 : i32
    scf.if %2 {
      %cst_16 = arith.constant 0.000000e+00 : f32
      %20 = vector.broadcast %cst_16 : f32 to vector<8x128xf32>
      %c0_17 = arith.constant 0 : index
      %c0_18 = arith.constant 0 : index
      %21 = vector.load %arg10[%c0_17, %c0_18] : memref<8x128xf32, #tpu.memory_space<vmem>>, vector<8x128xf32>
      tpu.vector_store %arg10[%c0_17, %c0_18], %20 {strides = array<i32>} : memref<8x128xf32, #tpu.memory_space<vmem>>, vector<8x128xf32>,
    } else {
    }
    %c0 = arith.constant 0 : index
    %c0_1 = arith.constant 0 : index
    %3 = vector.load %arg3[%c0, %c0_1] : memref<128x128xf32, #tpu.memory_space<vmem>>, vector<128x128xf32>
    %c0_2 = arith.constant 0 : index
    %c0_3 = arith.constant 0 : index
    %4 = vector.load %arg4[%c0_2, %c0_3] : memref<128x128xf32, #tpu.memory_space<vmem>>, vector<128x128xf32>
    %c0_4 = arith.constant 0 : index
    %c0_5 = arith.constant 0 : index
    %5 = vector.load %arg5[%c0_4, %c0_5] : memref<128x1xf32, #tpu.memory_space<vmem>>, vector<128x1xf32>
    %c0_6 = arith.constant 0 : index
    %c0_7 = arith.constant 0 : index
    %6 = vector.load %arg6[%c0_6, %c0_7] : memref<1x128xf32, #tpu.memory_space<vmem>>, vector<1x128xf32>
    %7 = vector.broadcast %5 : vector<128x1xf32> to vector<128x128xf32>
    %8 = vector.broadcast %6 : vector<1x128xf32> to vector<128x128xf32>
    %9 = arith.mulf %7, %8 : vector<128x128xf32>
    %10 = arith.mulf %4, %9 : vector<128x128xf32>
    %11 = arith.addf %3, %10 : vector<128x128xf32>
    %c0_8 = arith.constant 0 : index
    %c0_9 = arith.constant 0 : index
    %12 = vector.load %arg10[%c0_8, %c0_9] : memref<8x128xf32, #tpu.memory_space<vmem>>, vector<8x128xf32>
    %c0_10 = arith.constant 0 : index
    %c0_11 = arith.constant 0 : index
    %13 = vector.load %arg2[%c0_10, %c0_11] : memref<8x128xf32, #tpu.memory_space<vmem>>, vector<8x128xf32>
    %cst = arith.constant dense<0.000000e+00> : vector<8x128xf32>
    %14 = tpu.matmul %13, %11, %cst {dimension_numbers = #tpu.dot_dimension_numbers<[1], [0], [0], [1], [0, 0, 1, 1], [], []>} : vector<8x128xf32>, vector<128x128xf32>, vector<8x128xf32> -> vector<8x128xf32>
    %15 = arith.addf %12, %14 : vector<8x128xf32>
    %c0_12 = arith.constant 0 : index
    %c0_13 = arith.constant 0 : index
    %16 = vector.load %arg10[%c0_12, %c0_13] : memref<8x128xf32, #tpu.memory_space<vmem>>, vector<8x128xf32>
    tpu.vector_store %arg10[%c0_12, %c0_13], %15 {strides = array<i32>} : memref<8x128xf32, #tpu.memory_space<vmem>>, vector<8x128xf32>,
    %c0_i32_14 = arith.constant 0 : i32
    %17 = arith.cmpi eq, %arg1, %c0_i32_14 : i32
    %18 = arith.extui %17 : i1 to i32
    %c0_i32_15 = arith.constant 0 : i32
    %19 = arith.cmpi ne, %18, %c0_i32_15 : i32
    scf.if %19 {
      %c0_16 = arith.constant 0 : index
      %c0_17 = arith.constant 0 : index
      %20 = vector.load %arg7[%c0_16, %c0_17] : memref<1x128xf32, #tpu.memory_space<vmem>>, vector<1x128xf32>
      %c0_18 = arith.constant 0 : index
      %c0_19 = arith.constant 0 : index
      %21 = vector.load %arg8[%c0_18, %c0_19] : memref<1x128xf32, #tpu.memory_space<vmem>>, vector<1x128xf32>
      %c0_20 = arith.constant 0 : index
      %c0_21 = arith.constant 0 : index
      %22 = vector.load %arg6[%c0_20, %c0_21] : memref<1x128xf32, #tpu.memory_space<vmem>>, vector<1x128xf32>
      %23 = arith.mulf %21, %22 : vector<1x128xf32>
      %24 = arith.addf %20, %23 : vector<1x128xf32>
      %c0_22 = arith.constant 0 : index
      %c0_23 = arith.constant 0 : index
      %25 = vector.load %arg10[%c0_22, %c0_23] : memref<8x128xf32, #tpu.memory_space<vmem>>, vector<8x128xf32>
      %26 = vector.broadcast %24 : vector<1x128xf32> to vector<8x128xf32>
      %27 = arith.addf %25, %26 : vector<8x128xf32>
      %c0_24 = arith.constant 0 : index
      %c0_25 = arith.constant 0 : index
      %28 = vector.load %arg9[%c0_24, %c0_25] : memref<8x128xf32, #tpu.memory_space<vmem>>, vector<8x128xf32>
      tpu.vector_store %arg9[%c0_24, %c0_25], %27 {strides = array<i32>} : memref<8x128xf32, #tpu.memory_space<vmem>>, vector<8x128xf32>,
    } else {
    }
    return
  }
  func.func @transform_0(%arg0: i32, %arg1: i32) -> (i32, i32) {
    %c0_i32 = arith.constant 0 : i32
    %c0_i32_0 = arith.constant 0 : i32
    return %c0_i32, %arg1 : i32, i32
  }
  func.func @transform_1(%arg0: i32, %arg1: i32) -> (i32, i32) {
    %c0_i32 = arith.constant 0 : i32
    return %arg1, %arg0 : i32, i32
  }
  func.func @transform_2(%arg0: i32, %arg1: i32) -> (i32, i32) {
    %c0_i32 = arith.constant 0 : i32
    return %arg1, %arg0 : i32, i32
  }
  func.func @transform_3(%arg0: i32, %arg1: i32) -> (i32, i32) {
    %c0_i32 = arith.constant 0 : i32
    %c0_i32_0 = arith.constant 0 : i32
    return %arg1, %c0_i32 : i32, i32
  }
  func.func @transform_4(%arg0: i32, %arg1: i32) -> (i32, i32) {
    %c0_i32 = arith.constant 0 : i32
    %c0_i32_0 = arith.constant 0 : i32
    return %c0_i32, %arg0 : i32, i32
  }
  func.func @transform_5(%arg0: i32, %arg1: i32) -> (i32, i32) {
    %c0_i32 = arith.constant 0 : i32
    %c0_i32_0 = arith.constant 0 : i32
    return %c0_i32, %arg0 : i32, i32
  }
  func.func @transform_6(%arg0: i32, %arg1: i32) -> (i32, i32) {
    %c0_i32 = arith.constant 0 : i32
    %c0_i32_0 = arith.constant 0 : i32
    return %c0_i32, %arg0 : i32, i32
  }
  func.func @transform_7(%arg0: i32, %arg1: i32) -> (i32, i32) {
    %c0_i32 = arith.constant 0 : i32
    %c0_i32_0 = arith.constant 0 : i32
    return %c0_i32, %arg0 : i32, i32
  }
}

</mosaic_0001>

<bundles_post_ra>
// kernel: tpu_custom_call.1
= control target key start
LH: loop header
LB: loop body
LE: loop exit
PB: predicated region body
PF: predicated region fallthrough
CT: control target
= control target key end

     0   :  { %12 = vsyncpa [#allocation4], 0  ;;  %s677_s0 = inlined_call_operand.hbm [shape: f32[8,128], index: 0, kind: input, shape index: {}]   ;;  %s678_s1 = inlined_call_operand.vmem [shape: f32[128,128], index: 1, kind: input, shape index: {}]   ;;  %s679_s2 = inlined_call_operand.hbm [shape: f32[128,128], index: 2, kind: input, shape index: {}]   ;;  %s680_s3 = inlined_call_operand.vmem [shape: f32[128,1], index: 3, kind: input, shape index: {}]   ;;  %s681_s4 = inlined_call_operand.vmem [shape: f32[1,128], index: 4, kind: input, shape index: {}]   ;;  %s682_s5 = inlined_call_operand.vmem [shape: f32[1,128], index: 5, kind: input, shape index: {}]   ;;  %s683_s6 = inlined_call_operand.vmem [shape: f32[1,128], index: 6, kind: input, shape index: {}]   ;;  %s684_s7 = inlined_call_operand.hbm [shape: f32[8,128], index: 7, kind: output, shape index: {}]  }
   0x1   :  { %13 = vsyncpa [#allocation7], 0 }
   0x2   :  { %14 = vsyncpa [#allocation5], 0  ;;  %s477_s24 = smov [#allocation3]   ;;  %s478_s26 = smov [#allocation6]  }
   0x3   :  { %s21_s25 = sshll.u32 %s477_s24, 4  ;;  %s32_s27 = sshll.u32 %s478_s26, 4  ;;  %s22_s25 = int_to_ptr.vmem [resolvable:$true] %s21_s25  ;;  %s33_s27 = int_to_ptr.vmem [resolvable:$true] %s32_s27 }
   0x4   :  { %s419_s28 = scalar_lea.vmem %s22_s25, 128  ;;  %p424_p1 = scmp.lt.s32.totalorder %s22_s25, %s22_s25 }
   0x5   :  { %p420_p0 = scmp.ne.s32.totalorder %s22_s25, %s419_s28  ;;  %p425_p2 = scmp.lt.s32.totalorder %s419_s28, %s419_s28 }
   0x7   :  { %p426_p3 = por %p425_p2, %p424_p1 }
   0x9   :  { %p427_p4 = pnand %p426_p3, %p420_p0 }
   0xb   :  { %430 = shalt.err (!%p427_p4)
}
   0xc   :  { %24 = dma.hbm_to_vmem [thread:$0]  %s677_s0, 128, %s22_s25, [#allocation4]  }
   0xd   :  { %s439_s8 = scalar_lea.vmem %s33_s27, 2048  ;;  %p444_p6 = scmp.lt.s32.totalorder %s33_s27, %s33_s27 }
   0xe   :  { %p440_p5 = scmp.ne.s32.totalorder %s33_s27, %s439_s8  ;;  %p445_p7 = scmp.lt.s32.totalorder %s439_s8, %s439_s8 }
  0x10   :  { %p446_p8 = por %p445_p7, %p444_p6 }
  0x12   :  { %p447_p9 = pnand %p446_p8, %p440_p5 }
  0x14   :  { %450 = shalt.err (!%p447_p9)
}
  0x15   :  { %s479_s9 = smov 128   ;;  %s480_s10 = smov 8  }
  0x16   :  { %38 = dma.hbm_to_vmem [thread:$0]  %s679_s2, 2048, %s33_s27, [#allocation7], %s479_s9, %s479_s9, %s480_s10  }
  0x17   :  { %471 = dma.done.wait [#allocation4], 128  }
  0x18   :  { %472 = vsyncadd [#allocation4], 4294967168 }
  0x19   :  { %473 = dma.done.wait [#allocation7], 2048  }
  0x1a   :  { %474 = vsyncadd [#allocation7], 4294965248  ;;  %v481_v0 = vmov 0   ;;  %v105_v1 = vld [vmem:[%s680_s3 + $0x78] sm:$0xff]  ;;  %v103_v2 = vld [vmem:[%s680_s3 + $0x68] sm:$0xff]  ;;  %v482_v5 = vmov 0.0  }
  0x1b   :  { %410 = vset.pattern.permute.xlu1 %v481_v0  ;;  %409 = vset.pattern.permute.xlu0 %v481_v0  ;;  %v104_v3 = vld [vmem:[%s680_s3 + $0x70] sm:$0xff]  ;;  %v102_v4 = vld [vmem:[%s680_s3 + $0x60] sm:$0xff]  ;;  %v101_v6 = vld [vmem:[%s680_s3 + $0x58] sm:$0xff]  ;;  %vm483_vm0 = vmmov 0   ;;  %s484_s30 = smov [#allocation8]  }
  0x1c   :  { %184 = vperm.xlu0 %409, %v105_v1   ;;  %174 = vperm.xlu1 %410, %v103_v2   ;;  %v100_v7 = vld [vmem:[%s680_s3 + $0x50] sm:$0xff]  ;;  %v99_v8 = vld [vmem:[%s680_s3 + $0x48] sm:$0xff]  ;;  %v98_v9 = vld [vmem:[%s680_s3 + $0x40] sm:$0xff]  ;;  %s338_s8 = sshll.u32 %s484_s30, 4  ;;  %s339_s8 = int_to_ptr.vmem [resolvable:$true] %s338_s8 }
  0x1d   :  { %366 = vmatprep.subr.mxu0 %v482_v5  ;;  %v97_v10 = vld [vmem:[%s680_s3 + $0x38] sm:$0xff]  ;;  %v96_v11 = vld [vmem:[%s680_s3 + $0x30] sm:$0xff]  ;;  %v95_v12 = vld [vmem:[%s680_s3 + $0x28] sm:$0xff]  ;;  %398 = vmatprep.mubr.msk.f32.mxu0 %vm483_vm0, %v482_v5  ;;  %p456_p11 = scmp.lt.s32.totalorder %s339_s8, %s339_s8 }
  0x1e   :  { %v94_v13 = vld [vmem:[%s680_s3 + $0x20] sm:$0xff]  ;;  %v93_v14 = vld [vmem:[%s680_s3 + $0x18] sm:$0xff]  ;;  %v92_v15 = vld [vmem:[%s680_s3 + $0x10] sm:$0xff] }
  0x1f   :  { %v91_v16 = vld [vmem:[%s680_s3 + $0x8] sm:$0xff]  ;;  %v90_v17 = vld [vmem:[%s680_s3] sm:$0xff]  ;;  %v73_v23 = vld [vmem:[%s678_s1 + $0x78] sm:$0xff] }
  0x20   :  { %179 = vperm.xlu0 %409, %v104_v3   ;;  %169 = vperm.xlu1 %410, %v102_v4   ;;  %v584_v18 = vld [vmem:[%s681_s4] ss:$0 sm:$0xff]  ;;  %v87_v26 = vld [vmem:[#allocation6 + $0x68] sm:$0xff]  ;;  %v88_v28 = vld [vmem:[#allocation6 + $0x70] sm:$0xff] }
  0x21   :  { %v89_v20 = vld [vmem:[#allocation6 + $0x78] sm:$0xff]  ;;  %v86_v33 = vld [vmem:[#allocation6 + $0x60] sm:$0xff]  ;;  %v72_v34 = vld [vmem:[%s678_s1 + $0x70] sm:$0xff] }
  0x22   :  { %v85_v38 = vld [vmem:[#allocation6 + $0x58] sm:$0xff]  ;;  %v71_v40 = vld [vmem:[%s678_s1 + $0x68] sm:$0xff]  ;;  %v84_v45 = vld [vmem:[#allocation6 + $0x50] sm:$0xff] }
  0x23   :  { %v70_v46 = vld [vmem:[%s678_s1 + $0x60] sm:$0xff]  ;;  %v83_v50 = vld [vmem:[#allocation6 + $0x48] sm:$0xff]  ;;  %v69_v52 = vld [vmem:[%s678_s1 + $0x58] sm:$0xff] }
  0x24   :  { %164 = vperm.xlu0 %409, %v101_v6   ;;  %159 = vperm.xlu1 %410, %v100_v7   ;;  %v82_v57 = vld [vmem:[#allocation6 + $0x40] sm:$0xff]  ;;  %v68_v58 = vld [vmem:[%s678_s1 + $0x50] sm:$0xff]  ;;  %v81_v62 = vld [vmem:[#allocation6 + $0x38] sm:$0xff] }
  0x25   :  { %v67_v0 = vld [vmem:[%s678_s1 + $0x48] sm:$0xff]  ;;  %v80_v6 = vld [vmem:[#allocation6 + $0x30] sm:$0xff]  ;;  %v66_v7 = vld [vmem:[%s678_s1 + $0x40] sm:$0xff] }
  0x28   :  { %154 = vperm.xlu0 %409, %v99_v8   ;;  %149 = vperm.xlu1 %410, %v98_v9  }
  0x2c   :  { %144 = vperm.xlu0 %409, %v97_v10   ;;  %139 = vperm.xlu1 %410, %v96_v11   ;;  %v79_v11 = vld [vmem:[#allocation6 + $0x28] sm:$0xff] }
  0x30   :  { %134 = vperm.xlu0 %409, %v95_v12   ;;  %129 = vperm.xlu1 %410, %v94_v13   ;;  %v65_v13 = vld [vmem:[%s678_s1 + $0x38] sm:$0xff] }
  0x34   :  { %124 = vperm.xlu0 %409, %v93_v14   ;;  %119 = vperm.xlu1 %410, %v92_v15  }
  0x38   :  { %114 = vperm.xlu0 %409, %v91_v16   ;;  %109 = vperm.xlu1 %410, %v90_v17  }
  0x97   :  { %v185_v19 = vpop.permute.xlu0 %184  ;;  %v175_v21 = vpop.permute.xlu1 %174 }
  0x98   :  { %v208_v22 = vmul.f32 %v584_v18, %v185_v19  ;;  %v206_v25 = vmul.f32 %v584_v18, %v175_v21  ;;  %v78_v19 = vld [vmem:[#allocation6 + $0x20] sm:$0xff] }
  0x9a   :  { %v224_v24 = vmul.f32 %v208_v22, %v89_v20  ;;  %v222_v35 = vmul.f32 %v206_v25, %v87_v26  ;;  %v64_v20 = vld [vmem:[%s678_s1 + $0x30] sm:$0xff]  ;;  %v63_v26 = vld [vmem:[%s678_s1 + $0x28] sm:$0xff] }
  0x9b   :  { %v180_v27 = vpop.permute.xlu0 %179  ;;  %v170_v29 = vpop.permute.xlu1 %169 }
  0x9c   :  { %v207_v30 = vmul.f32 %v584_v18, %v180_v27  ;;  %v205_v31 = vmul.f32 %v584_v18, %v170_v29  ;;  %v240_v32 = vadd.f32 %v224_v24, %v73_v23  ;;  %v238_v48 = vadd.f32 %v222_v35, %v71_v40  ;;  %v77_v24 = vld [vmem:[#allocation6 + $0x18] sm:$0xff] }
  0x9e   :  { %v223_v36 = vmul.f32 %v207_v30, %v88_v28  ;;  %367 = vmatpush3.msra.mxu0 %v240_v32  ;;  %v221_v41 = vmul.f32 %v205_v31, %v86_v33  ;;  %v76_v31 = vld [vmem:[#allocation6 + $0x10] sm:$0xff]  ;;  %v62_v32 = vld [vmem:[%s678_s1 + $0x20] sm:$0xff] }
  0x9f   :  { %v165_v37 = vpop.permute.xlu0 %164  ;;  %v160_v39 = vpop.permute.xlu1 %159  ;;  %368 = vmatprep.subr.mxu0 %v482_v5 }
  0xa0   :  { %v204_v42 = vmul.f32 %v584_v18, %v165_v37  ;;  %v203_v43 = vmul.f32 %v584_v18, %v160_v39  ;;  %v239_v44 = vadd.f32 %v223_v36, %v72_v34  ;;  %v237_v56 = vadd.f32 %v221_v41, %v70_v46  ;;  %v75_v36 = vld [vmem:[#allocation6 + $0x8] sm:$0xff] }
  0xa2   :  { %v220_v47 = vmul.f32 %v204_v42, %v85_v38  ;;  %369 = vmatpush3.msra.mxu0 %v239_v44  ;;  %v219_v53 = vmul.f32 %v203_v43, %v84_v45  ;;  %v61_v38 = vld [vmem:[%s678_s1 + $0x18] sm:$0xff]  ;;  %v74_v43 = vld [vmem:[#allocation6] sm:$0xff]  ;;  %v60_v44 = vld [vmem:[%s678_s1 + $0x10] sm:$0xff] }
  0xa3   :  { %v155_v49 = vpop.permute.xlu0 %154  ;;  %v150_v51 = vpop.permute.xlu1 %149  ;;  %370 = vmatprep.subr.mxu0 %v482_v5 }
  0xa4   :  { %v202_v54 = vmul.f32 %v584_v18, %v155_v49  ;;  %v201_v55 = vmul.f32 %v584_v18, %v150_v51  ;;  %371 = vmatpush3.msra.mxu0 %v238_v48  ;;  %v236_v60 = vadd.f32 %v220_v47, %v69_v52  ;;  %v235_v4 = vadd.f32 %v219_v53, %v68_v58  ;;  %v59_v47 = vld [vmem:[%s678_s1 + $0x8] sm:$0xff]  ;;  %v58_v49 = vld [vmem:[%s678_s1] sm:$0xff] }
  0xa5   :  { %372 = vmatprep.subr.mxu0 %v482_v5  ;;  %v242_v52 = vld [vmem:[#allocation3] sm:$0xff]  ;;  %v325_v53 = vlaneseq }
  0xa6   :  { %v218_v59 = vmul.f32 %v202_v54, %v83_v50  ;;  %373 = vmatpush3.msra.mxu0 %v237_v56  ;;  %v217_v1 = vmul.f32 %v201_v55, %v82_v57  ;;  %v319_v54 = vld [vmem:[%s683_s6] sm:$0x1]  ;;  %s451_s6 = scalar_lea.vmem %s339_s8, 128 }
  0xa7   :  { %v145_v61 = vpop.permute.xlu0 %144  ;;  %v140_v63 = vpop.permute.xlu1 %139  ;;  %374 = vmatprep.subr.mxu0 %v482_v5  ;;  %v320_v55 = vld [vmem:[%s681_s4] sm:$0x1]  ;;  %v326_v57 = vshrl.u32 %v325_v53, 7  ;;  %p452_p10 = scmp.ne.s32.totalorder %s339_s8, %s451_s6  ;;  %p457_p12 = scmp.lt.s32.totalorder %s451_s6, %s451_s6 }
  0xa8   :  { %v200_v2 = vmul.f32 %v584_v18, %v145_v61  ;;  %v199_v3 = vmul.f32 %v584_v18, %v140_v63  ;;  %375 = vmatpush3.msra.mxu0 %v236_v60  ;;  %v234_v9 = vadd.f32 %v218_v59, %v67_v0  ;;  %v233_v17 = vadd.f32 %v217_v1, %v66_v7  ;;  %v318_v58 = vld [vmem:[%s682_s5] sm:$0x1] }
  0xa9   :  { %376 = vmatprep.subr.mxu0 %v482_v5  ;;  %v321_v56 = vmul.f32 %v320_v55, %v319_v54  ;;  %v327_v60 = vsub.s32 0, %v326_v57  ;;  %p458_p13 = por %p457_p12, %p456_p11 }
  0xaa   :  { %v216_v8 = vmul.f32 %v200_v2, %v81_v62  ;;  %377 = vmatpush3.msra.mxu0 %v235_v4  ;;  %v215_v14 = vmul.f32 %v199_v3, %v80_v6 }
  0xab   :  { %v135_v10 = vpop.permute.xlu0 %134  ;;  %v130_v12 = vpop.permute.xlu1 %129  ;;  %378 = vmatprep.subr.mxu0 %v482_v5  ;;  %v322_v59 = vadd.f32 %v321_v56, %v318_v58  ;;  %p459_p0 = pnand %p458_p13, %p452_p10 }
  0xac   :  { %v198_v15 = vmul.f32 %v584_v18, %v135_v10  ;;  %v197_v16 = vmul.f32 %v584_v18, %v130_v12  ;;  %379 = vmatpush3.msra.mxu0 %v234_v9  ;;  %v232_v22 = vadd.f32 %v216_v8, %v65_v13  ;;  %v231_v30 = vadd.f32 %v215_v14, %v64_v20 }
  0xad   :  { %380 = vmatprep.subr.mxu0 %v482_v5 }
  0xae   :  { %v214_v21 = vmul.f32 %v198_v15, %v79_v11  ;;  %381 = vmatpush3.msra.mxu0 %v233_v17  ;;  %v213_v27 = vmul.f32 %v197_v16, %v78_v19 }
  0xaf   :  { %v125_v23 = vpop.permute.xlu0 %124  ;;  %v120_v25 = vpop.permute.xlu1 %119  ;;  %382 = vmatprep.subr.mxu0 %v482_v5 }
  0xb0   :  { %v196_v28 = vmul.f32 %v584_v18, %v125_v23  ;;  %v195_v29 = vmul.f32 %v584_v18, %v120_v25  ;;  %383 = vmatpush3.msra.mxu0 %v232_v22  ;;  %v230_v34 = vadd.f32 %v214_v21, %v63_v26  ;;  %v229_v42 = vadd.f32 %v213_v27, %v62_v32 }
  0xb1   :  { %384 = vmatprep.subr.mxu0 %v482_v5 }
  0xb2   :  { %v212_v33 = vmul.f32 %v196_v28, %v77_v24  ;;  %385 = vmatpush3.msra.mxu0 %v231_v30  ;;  %v211_v39 = vmul.f32 %v195_v29, %v76_v31 }
  0xb3   :  { %v115_v35 = vpop.permute.xlu0 %114  ;;  %v110_v37 = vpop.permute.xlu1 %109  ;;  %386 = vmatprep.subr.mxu0 %v482_v5 }
  0xb4   :  { %v194_v40 = vmul.f32 %v584_v18, %v115_v35  ;;  %v193_v41 = vmul.f32 %v584_v18, %v110_v37  ;;  %387 = vmatpush3.msra.mxu0 %v230_v34  ;;  %v228_v46 = vadd.f32 %v212_v33, %v61_v38  ;;  %v227_v18 = vadd.f32 %v211_v39, %v60_v44 }
  0xb5   :  { %388 = vmatprep.subr.mxu0 %v482_v5 }
  0xb6   :  { %v210_v45 = vmul.f32 %v194_v40, %v75_v36  ;;  %389 = vmatpush3.msra.mxu0 %v229_v42  ;;  %v209_v48 = vmul.f32 %v193_v41, %v74_v43 }
  0xb7   :  { %390 = vmatprep.subr.mxu0 %v482_v5 }
  0xb8   :  { %391 = vmatpush3.msra.mxu0 %v228_v46  ;;  %v226_v50 = vadd.f32 %v210_v45, %v59_v47  ;;  %v225_v51 = vadd.f32 %v209_v48, %v58_v49 }
  0xb9   :  { %392 = vmatprep.subr.mxu0 %v482_v5 }
  0xba   :  { %393 = vmatpush3.msra.mxu0 %v227_v18 }
  0xbb   :  { %394 = vmatprep.subr.mxu0 %v482_v5 }
  0xbc   :  { %395 = vmatpush3.msra.mxu0 %v226_v50 }
  0xbd   :  { %396 = vmatprep.subr.mxu0 %v482_v5  ;;  %v328_v5 = vrot.slane %v322_v59, %v327_v60 }
  0xbe   :  { %397 = vmatpush3.msra.mxu0 %v225_v51 }
  0xbf   :  { %399 = vmatmul.mubr.f32.vlgmr.msra.gmra.mxu0 %v242_v52 }
 0x17f   :  { %v309_v61 = vpop.f32.mrf.mxu0 }
 0x180   :  { %v330_v62 = vadd.f32 %v328_v5, %v309_v61 }
 0x181   :  { %v400_v63 = vpop.f32.mrf.mxu0 }
 0x182   :  { %331 = vst [vmem:[#allocation8] sm:$0xff] %v330_v62 }
 0x183   :  { %462 = shalt.err (!%p459_p0)
}
 0x184   :  { %341 = dma.vmem_to_hbm [thread:$0]  %s339_s8, 128, %s684_s7, [#allocation5]  }
 0x185   :  { %475 = dma.done.wait [#allocation5], 128  }
 0x186   :  { %476 = vsyncadd [#allocation5], 4294967168 }
 0x187   :  { %345 = vsyncpa [#allocation4], 1 }
 0x188   :  { %346 = vsyncpa [#allocation7], 1 }
 0x189   :  { %347 = vsyncpa [#allocation5], 1 }

</bundles_post_ra>
